<compile_context>
chip_gen: v6e
topology: v6e:2x2x1
jax: 0.10.0
libtpu: 0.0.40
codegen_flags: <defaults>
</compile_context>

<pallas_src>
import jax
import jax.numpy as jnp
from jax import lax
from jax.experimental import pallas as pl
from jax.experimental.pallas import tpu as pltpu

LANE = 128


def _round_up(a, b):
    return ((a + b - 1) // b) * b


def _largest_divisor_leq(n, cap):
    cap = max(1, min(n, cap))
    for d in range(cap, 0, -1):
        if n % d == 0:
            return d
    return 1


def _make_chunked_kernel(*, bt, tc, tk, hw, nk):
    """Multi-chunk (tk % 128 == 0) reduction kernel; grid k axis has nk steps."""
    n_chunks = tk // LANE
    rem_last = hw - (nk - 1) * tk            # valid lanes in the last k-step
    padded = (nk * tk != hw)
    first_masked = (rem_last // LANE) if padded else n_chunks
    inv_hw = 1.0 / float(hw)
    unroll = int(max(1, min(first_masked, 8, 256 // max(bt * tc, 1))))

    def body(x_ref, o_ref, max_acc, sum_acc):
        k = pl.program_id(2)

        # Running accumulators for this grid step: registers, loaded from /
        # stored to VMEM scratch only at step boundaries (and only if nk > 1).
        if nk == 1:
            mx = jnp.full((bt, tc, LANE), -jnp.inf, jnp.float32)
            sm = jnp.zeros((bt, tc, LANE), jnp.float32)
        else:
            @pl.when(k == 0)
            def _init():
                max_acc[...] = jnp.full((bt, tc, LANE), -jnp.inf, jnp.float32)
                sum_acc[...] = jnp.zeros((bt, tc, LANE), jnp.float32)

            mx = max_acc[...]
            sm = sum_acc[...]

        def get_chunk(start):
            return x_ref[:, :, pl.ds(start, LANE)].astype(jnp.float32)

        if first_masked > 0:
            def unmasked(q, carry):
                mx_c, sm_c = carry
                chunk = get_chunk(pl.multiple_of(q * LANE, LANE))
                return jnp.maximum(mx_c, chunk), sm_c + chunk

            mx, sm = lax.fori_loop(0, first_masked, unmasked, (mx, sm),
                                   unroll=unroll)

        if first_masked < n_chunks:
            # Tail chunks that may contain out-of-bounds garbage in the last
            # grid step.  For earlier steps the threshold is >= 128, so the
            # selects are a no-op there.
            valid_here = hw - k * tk
            lane_iota = lax.broadcasted_iota(jnp.int32, (bt, tc, LANE), 2)
            for q in range(first_masked, n_chunks):
                chunk = get_chunk(q * LANE)
                valid = lane_iota < (valid_here - q * LANE)
                mx = jnp.maximum(mx, jnp.where(valid, chunk, -jnp.inf))
                sm = sm + jnp.where(valid, chunk, 0.0)

        if nk > 1:
            max_acc[...] = mx
            sum_acc[...] = sm

        @pl.when(k == nk - 1)
        def _finalize():
            mx_f = jnp.max(mx, axis=2)                    # (bt, tc)
            av_f = jnp.sum(sm, axis=2) * inv_hw           # (bt, tc)
            o_ref[:, 0:1, :] = mx_f[:, None, :].astype(o_ref.dtype)
            o_ref[:, 1:2, :] = av_f[:, None, :].astype(o_ref.dtype)

    if nk > 1:
        def kernel(x_ref, o_ref, max_acc, sum_acc):
            body(x_ref, o_ref, max_acc, sum_acc)
    else:
        def kernel(x_ref, o_ref):
            body(x_ref, o_ref, None, None)
    return kernel


def _make_direct_kernel(*, hw):
    """Single-block path for small maps whose H*W is not a multiple of 128."""
    inv_hw = 1.0 / float(hw)

    def kernel(x_ref, o_ref):
        x = x_ref[...].astype(jnp.float32)                # (bt, tc, hw)
        mx = jnp.max(x, axis=2)
        av = jnp.sum(x, axis=2) * inv_hw
        o_ref[:, 0:1, :] = mx[:, None, :].astype(o_ref.dtype)
        o_ref[:, 1:2, :] = av[:, None, :].astype(o_ref.dtype)

    return kernel


def adaptive_concat_pool2d(x):
    """x: (N, C, H, W) float -> (N, 2*C, 1, 1); channels [0:C]=max, [C:2C]=avg."""
    N, C, H, W = x.shape
    HW = H * W
    itemsize = x.dtype.itemsize

    x3 = x.reshape(N, C, HW)                  # contiguous -> free reshape

    # ---- channel tiling: C (full) if C <= 128, else 128-wide blocks (cdiv grid;
    #      boundary-channel garbage is simply dropped on output writeback).
    tc = C if C <= LANE else LANE
    gc = pl.cdiv(C, tc)

    # ---- spatial tiling: big lane-dense tiles, <= ~4 MiB per input block.
    BLOCK_BYTES = 4 << 20
    tk_cap = min(8192, max(LANE, (BLOCK_BYTES // (tc * itemsize)) // LANE * LANE))

    if HW % LANE != 0 and HW <= tk_cap:
        mode = "direct"
        tk, gk = HW, 1
    else:
        mode = "chunked"
        gk0 = pl.cdiv(HW, tk_cap)
        tk = min(_round_up(pl.cdiv(HW, gk0), LANE), tk_cap)
        gk = pl.cdiv(HW, tk)

    # ---- batch packing (only when a whole (C, HW) slab fits in one block).
    bt = 1
    if gc == 1 and gk == 1 and N > 1:
        if mode == "chunked":
            cap = max(1, LANE // tc)                       # keep f32 carries <= 32 vregs
        else:
            cap = max(1, (2 << 20) // max(1, tc * tk * itemsize))
        cap = min(cap, max(1, N // 2))                     # >= 2 parallel n-steps (v7x: 2 TCs)
        bt = _largest_divisor_leq(N, cap)
    gn = N // bt

    block_bytes = bt * tc * tk * itemsize
    vmem_limit = int(min(32 << 20, max(16 << 20, 3 * block_bytes + (2 << 20))))

    if mode == "chunked":
        kernel = _make_chunked_kernel(bt=bt, tc=tc, tk=tk, hw=HW, nk=gk)
        grid = (gn, gc, gk)
        in_specs = [pl.BlockSpec((bt, tc, tk), lambda n, c, k: (n, c, k))]
        out_specs = pl.BlockSpec((bt, 2, tc), lambda n, c, k: (n, 0, c))
        scratch_shapes = ([pltpu.VMEM((bt, tc, LANE), jnp.float32),
                           pltpu.VMEM((bt, tc, LANE), jnp.float32)]
                          if gk > 1 else [])
        dim_sem = ("parallel", "parallel", "arbitrary")
    else:
        kernel = _make_direct_kernel(hw=HW)
        grid = (gn, gc)
        in_specs = [pl.BlockSpec((bt, tc, tk), lambda n, c: (n, c, 0))]
        out_specs = pl.BlockSpec((bt, 2, tc), lambda n, c: (n, 0, c))
        scratch_shapes = []
        dim_sem = ("parallel", "parallel")

    out = pl.pallas_call(
        kernel,
        out_shape=jax.ShapeDtypeStruct((N, 2, C), x.dtype),
        grid_spec=pltpu.PrefetchScalarGridSpec(
            num_scalar_prefetch=0,
            grid=grid,
            in_specs=in_specs,
            out_specs=out_specs,
            scratch_shapes=scratch_shapes,
        ),
        compiler_params=pltpu.CompilerParams(
            dimension_semantics=dim_sem,
            vmem_limit_bytes=vmem_limit,
        ),
    )(x3)

    # (N, 2, C) row-major reshape -> [max channels..., avg channels...] per
    # sample, exactly matching torch.cat([mp(x), ap(x)], dim=1).
    return out.reshape(N, 2 * C, 1, 1)


def _reference(x):
    mx = jnp.max(x, axis=(2, 3), keepdims=True)
    av = jnp.mean(x, axis=(2, 3), keepdims=True)
    return jnp.concatenate([mx, av], axis=1)


if __name__ == "__main__":
    key = jax.random.PRNGKey(0)

    # Primary shape implied by the module spec.
    x = jax.random.normal(key, (2, 4, 16, 16), dtype=jnp.float32)
    out = jax.block_until_ready(adaptive_concat_pool2d(x))
    ref = _reference(x)
    assert out.shape == (2, 8, 1, 1), out.shape
    assert jnp.allclose(out, ref, atol=1e-5, rtol=1e-5)

    # Extra small shapes exercising the other tiling paths.
    for shape in ((2, 3, 7, 7),        # direct path (H*W not a multiple of 128)
                  (2, 256, 12, 12),    # channel-tiled path (C > 128)
                  (1, 8, 91, 91)):     # multi-step reduction + ragged tail masking
        k2 = jax.random.fold_in(key, sum(shape))
        xi = jax.random.normal(k2, shape, dtype=jnp.float32)
        oi = jax.block_until_ready(adaptive_concat_pool2d(xi))
        ri = _reference(xi)
        assert oi.shape == (shape[0], 2 * shape[1], 1, 1), oi.shape
        assert jnp.allclose(oi, ri, atol=1e-4, rtol=1e-4), shape

    print("KERNEL_OK")
</pallas_src>

<mosaic_0001>
module attributes {stable_mosaic.version = 11 : i64} {
  func.func @kernel(%arg0: i32, %arg1: i32, %arg2: i32, %arg3: memref<1x4x256xf32, #tpu.memory_space<vmem>>, %arg4: memref<1x2x4xf32, #tpu.memory_space<vmem>>) attributes {dimension_semantics = [#tpu.dimension_semantics<parallel>, #tpu.dimension_semantics<parallel>, #tpu.dimension_semantics<arbitrary>], iteration_bounds = array<i64: 2, 1, 1>, scalar_prefetch = 0 : i64, scratch_operands = 0 : i64, tpu.core_type = #tpu.core_type<tc>, window_params = [{transform_indices = @transform_0, window_bounds = array<i64: 1, 4, 256>}, {transform_indices = @transform_1, window_bounds = array<i64: 1, 2, 4>}]} {
    %cst = arith.constant 0xFF800000 : f32
    %0 = vector.broadcast %cst : f32 to vector<1x4x128xf32>
    %cst_0 = arith.constant 0.000000e+00 : f32
    %1 = vector.broadcast %cst_0 : f32 to vector<1x4x128xf32>
    %c0_i32 = arith.constant 0 : i32
    %c128_i32 = arith.constant 128 : i32
    %2 = arith.muli %c0_i32, %c128_i32 : i32
    %3 = tpu.assume_multiple %2, 128 : i32
    %c0 = arith.constant 0 : index
    %c0_1 = arith.constant 0 : index
    %4 = arith.index_cast %3 : i32 to index
    %5 = vector.load %arg3[%c0, %c0_1, %4] : memref<1x4x256xf32, #tpu.memory_space<vmem>>, vector<1x4x128xf32>
    %6 = arith.maximumf %0, %5 : vector<1x4x128xf32>
    %7 = arith.addf %1, %5 : vector<1x4x128xf32>
    %c1_i32 = arith.constant 1 : i32
    %c128_i32_2 = arith.constant 128 : i32
    %8 = arith.muli %c1_i32, %c128_i32_2 : i32
    %9 = tpu.assume_multiple %8, 128 : i32
    %c0_3 = arith.constant 0 : index
    %c0_4 = arith.constant 0 : index
    %10 = arith.index_cast %9 : i32 to index
    %11 = vector.load %arg3[%c0_3, %c0_4, %10] : memref<1x4x256xf32, #tpu.memory_space<vmem>>, vector<1x4x128xf32>
    %12 = arith.maximumf %6, %11 : vector<1x4x128xf32>
    %13 = arith.addf %7, %11 : vector<1x4x128xf32>
    %c2_i32 = arith.constant 2 : i32
    %c0_i32_5 = arith.constant 0 : i32
    %14 = arith.cmpi eq, %arg2, %c0_i32_5 : i32
    %15 = arith.extui %14 : i1 to i32
    %c0_i32_6 = arith.constant 0 : i32
    %16 = arith.cmpi ne, %15, %c0_i32_6 : i32
    scf.if %16 {
      %cst_7 = arith.constant dense<0xFF800000> : vector<1x4xf32>
      %17 = vector.multi_reduction <maximumf>, %12, %cst_7 [2] : vector<1x4x128xf32> to vector<1x4xf32>
      %cst_8 = arith.constant dense<0.000000e+00> : vector<1x4xf32>
      %18 = vector.multi_reduction <add>, %13, %cst_8 [2] : vector<1x4x128xf32> to vector<1x4xf32>
      %cst_9 = arith.constant 3.906250e-03 : f32
      %19 = vector.broadcast %cst_9 : f32 to vector<1x4xf32>
      %20 = arith.mulf %18, %19 : vector<1x4xf32>
      %21 = vector.shape_cast %17 : vector<1x4xf32> to vector<1x1x4xf32>
      %c0_10 = arith.constant 0 : index
      %c0_11 = arith.constant 0 : index
      %c0_12 = arith.constant 0 : index
      %22 = vector.load %arg4[%c0_10, %c0_11, %c0_12] : memref<1x2x4xf32, #tpu.memory_space<vmem>>, vector<1x1x4xf32>
      tpu.vector_store %arg4[%c0_10, %c0_11, %c0_12], %21 {strides = array<i32>} : memref<1x2x4xf32, #tpu.memory_space<vmem>>, vector<1x1x4xf32>,
      %23 = vector.shape_cast %20 : vector<1x4xf32> to vector<1x1x4xf32>
      %c0_13 = arith.constant 0 : index
      %c1 = arith.constant 1 : index
      %c0_14 = arith.constant 0 : index
      %24 = vector.load %arg4[%c0_13, %c1, %c0_14] : memref<1x2x4xf32, #tpu.memory_space<vmem>>, vector<1x1x4xf32>
      tpu.vector_store %arg4[%c0_13, %c1, %c0_14], %23 {strides = array<i32>} : memref<1x2x4xf32, #tpu.memory_space<vmem>>, vector<1x1x4xf32>,
    } else {
    }
    return
  }
  func.func @transform_0(%arg0: i32, %arg1: i32, %arg2: i32) -> (i32, i32, i32) {
    %c0_i32 = arith.constant 0 : i32
    return %arg0, %arg1, %arg2 : i32, i32, i32
  }
  func.func @transform_1(%arg0: i32, %arg1: i32, %arg2: i32) -> (i32, i32, i32) {
    %c0_i32 = arith.constant 0 : i32
    %c0_i32_0 = arith.constant 0 : i32
    return %arg0, %c0_i32, %arg1 : i32, i32, i32
  }
}

</mosaic_0001>

<bundles_post_ra>
// kernel: tpu_custom_call.1
= control target key start
LH: loop header
LB: loop body
LE: loop exit
PB: predicated region body
PF: predicated region fallthrough
CT: control target
= control target key end

     0   :  { %6 = vsyncpa [#allocation3], 0  ;;  %s635_s0 = inlined_call_operand.hbm [shape: f32[2,4,256], index: 0, kind: input, shape index: {}]   ;;  %s636_s1 = inlined_call_operand.hbm [shape: f32[2,2,4], index: 1, kind: output, shape index: {}]  }
   0x1   :  { %8 = vsyncpa [#allocation3 + $0x1], 0 }
   0x2   :  { %9 = vsyncpa [#allocation4], 0 }
   0x3   :  { %11 = vsyncpa [#allocation4 + $0x1], 0  ;;  %s500_s6 = smov 0   ;;  %s502_s7 = smov 0  }
   0x4   :  { %s504_s8 = smov 0   ;;  %s506_s9 = smov 0  }
   0x5   :  { %s508_s10 = smov 0   ;;  %s510_s11 = smov 0  }
   0x6 LB: > { %s300_s12 = sadd.s32 4294967295, %s486_s11   ;;  %s301_s13 = sadd.s32 4294967294, %s486_s11   ;;  %s486_s11 = sphi %s510_s11, %s17_s11   ;;  %s482_s10 = sphi %s508_s10, %s648_s10   ;;  %s478_s9 = sphi %s506_s9, %s647_s9   ;;  %s474_s8 = sphi %s504_s8, %s646_s8   ;;  %s470_s7 = sphi %s502_s7, %s645_s7   ;;  %s466_s6 = sphi %s500_s6, %s644_s6  }
   0x7   : > { %s36_s14 = sadd.s32 1, %s482_s10  ;;  %s47_s15 = sadd.s32 1, %s474_s8 }
   0x8   : > { %p38_p0 = scmp.ge.s32.totalorder %s36_s14, 2  ;;  %p54_p1 = scmp.ne.s32.totalorder %s474_s8, %s470_s7 }
   0x9   : > { %p55_p2 = scmp.eq.s32.totalorder %s486_s11, 0  ;;  %p60_p3 = scmp.ne.s32.totalorder %s470_s7, %s466_s6 }
   0xa   : > { %s650_s14 = smov (%p38_p0, %s36_s14), 0  ;;  %p61_p5 = scmp.eq.s32.totalorder %s300_s12, 0 }
   0xb   : > { %p541_p4 = por %p55_p2, %p54_p1  ;;  %s40_s17 = ssub.s32 %s482_s10, %s650_s14 }
   0xc   : > { %p86_p6 = scmp.eq.s32.totalorder %s300_s12, 1  ;;  %p45_p7 = scmp.eq.s32.totalorder %s40_s17, 0 }
   0xd   : > { %p547_p8 = por %p61_p5, %p60_p3  ;;  %p92_p10 = scmp.eq.s32.totalorder %s301_s13, 1 }
   0xe   : > { %p551_p9 = por %p86_p6, %p54_p1  ;;  %p328_p13 = scmp.lt.s32.totalorder %s486_s11, 2 }
   0xf   : > { %s556_s20 = scalar_select %p45_p7, %s474_s8, %s47_s15  }
  0x10   : > { %p558_p11 = por %p92_p10, %p60_p3  ;;  %s112_s22 = sand.u32 1, %s474_s8  }
  0x11   : > { %s304_s23 = sshll.u32 %s112_s22, 3  ;;  %s315_s24 = sshll.u32 %s482_s10, 7 }
  0x12   : > { %s640_s21 = scalar_select %p558_p11, 1, 0 }
  0x13   : > { %s126_s27 = scalar_lea.hbm %s635_s0, %s315_s24  ;;  %s116_s28 = scalar_lea.vmem [#allocation2], %s304_s23 }
  0x14   : > { %s128_s29 = sshll.u32 %s116_s28, 4  ;;  %p571_p0 = pnand %p328_p13, %p541_p4  ;;  %s129_s29 = int_to_ptr.vmem [resolvable:$true] %s128_s29 }
  0x15   : > { %p307_p1 = scmp.ge.s32.totalorder %s486_s11, 1  ;;  %p133_p2 = scmp.lt.s32.totalorder %s486_s11, 3 }
  0x16   : > { %s113_s2 = scalar_lea.sflag [#allocation3], %s112_s22  ;;  %p380_p3 = pneg %p571_p0 }
  0x17   : > { %s391_s3 = scalar_lea.vmem %s129_s29, 128  ;;  %s488_s4 = smov [#allocation2]  }
  0x18   : > { %p392_p5 = scmp.ne.s32.totalorder %s129_s29, %s391_s3  ;;  %s396_s5 = sshll.u32 %s488_s4, 4  ;;  %s397_s5 = int_to_ptr.vmem [resolvable:$false] %s396_s5 }
  0x19   : > { %s398_s12 = scalar_lea.vmem %s397_s5, 256  ;;  %p399_p10 = scmp.lt.s32.totalorder %s129_s29, %s397_s5 }
  0x1a   : > { %p394_p6 = pnand %p392_p5, %p380_p3  ;;  %p400_p12 = scmp.lt.s32.totalorder %s398_s12, %s391_s3 }
  0x1c   : > { %p395_p7 = pneg %p394_p6  ;;  %p401_p4 = por %p400_p12, %p399_p10 }
  0x1e   : > { %p402_p13 = pnand %p401_p4, %p395_p7 }
  0x20   : > { %405 = shalt.err (!%p402_p13)
}
  0x21   : > { %323 = dma.hbm_to_vmem [thread:$0]  (!%p571_p0), %s126_s27, 128, %s129_s29, %s113_s2  }
  0x22   : > { %p134_p11 = pnand %p307_p1, %p133_p2 }
  0x23   : > { %s586_s13 = sand.u32 (!%p134_p11), 1, %s470_s7  }
  0x24   : > { %137 = sbr.rel (%p134_p11) target bundleno = 203 (0xcb), region = 24  ;;  %s308_s15 = sshll.u32 (!%p134_p11), %s586_s13, 3 }
  0x25   : > { %s140_s16 = scalar_lea.sflag (!%p134_p11), [#allocation3], %s586_s13  ;;  %s143_s17 = scalar_lea.vmem (!%p134_p11), [#allocation2], %s308_s15 }
  0x29   : > { %457 = dma.done.wait (%p547_p8), %s140_s16, 128  }
  0x2a   : > { %459 = vsyncadd (%p547_p8), %s140_s16, 4294967168  ;;  %v163_v0 = vld [vmem:[%s143_s17] sm:$0xf]  ;;  %v310_v1 = vld [vmem:[%s143_s17 + $0x4] sm:$0xf]  ;;  %vm173_vm0 = vcmask 1043456   ;;  %v182_v6 = vlaneseq }
  0x2b   : > { %v168_v2 = vadd.f32 %v310_v1, %v163_v0  ;;  %v167_v3 = vmax.f32 %v163_v0, %v310_v1  ;;  %s309_s22 = sshll.u32 %s586_s13, 1  ;;  %vm189_vm1 = vcmask 24576   ;;  %s312_s18 = sshll.u32 %s478_s9, 5 }
  0x2c   : > { %v183_v7 = vand.u32 127, %v182_v6  ;;  %v185_v8 = vshrl.u32 %v182_v6, 7  ;;  %s161_s23 = scalar_lea.vmem [#allocation5], %s309_s22  ;;  %s211_s27 = scalar_lea.hbm %s636_s1, %s312_s18 }
  0x2d   : > { %v177_v4 = vsel %vm173_vm0, %v168_v2, 0.0  ;;  %v174_v5 = vsel %vm173_vm0, %v167_v3, -inf  ;;  %s213_s24 = sshll.u32 %s161_s23, 4  ;;  %s199_s28 = scalar_lea.sflag [#allocation4], %s586_s13  ;;  %s214_s24 = int_to_ptr.vmem [resolvable:$true] %s213_s24 }
  0x2e   : > { %178 = vadd.xlane.f32.xlu0 %v177_v4  ;;  %v186_v9 = vsub.s32 %v183_v7, %v185_v8  ;;  %s406_s29 = scalar_lea.vmem %s214_s24, 32  ;;  %s489_s30 = smov [#allocation5]  }
  0x2f   : > { %p407_p8 = scmp.ne.s32.totalorder %s214_s24, %s406_s29  ;;  %s410_s9 = sshll.u32 %s489_s30, 4  ;;  %s411_s9 = int_to_ptr.vmem [resolvable:$false] %s410_s9 }
  0x30   : > { %s412_s2 = scalar_lea.vmem %s411_s9, 64  ;;  %p413_p0 = scmp.lt.s32.totalorder %s214_s24, %s411_s9 }
  0x31   : > { %p408_p11 = pnand %p407_p8, %p551_p9  ;;  %p414_p1 = scmp.lt.s32.totalorder %s412_s2, %s406_s29 }
  0x32   : > { %175 = vmax.xlane.f32.xlu0 %v174_v5 }
  0x33   : > { %p409_p12 = pneg %p408_p11  ;;  %p415_p2 = por %p414_p1, %p413_p0 }
  0x35   : > { %p416_p3 = pnand %p415_p2, %p409_p12 }
  0xb7   : > { %v179_v10 = vpop.xlane.xlu0 %178 }
  0xb8   : > { %v180_v11 = vmul.f32 0.00390625, %v179_v10 }
  0xba   : > { %v195_v12 = vrot.slane %v180_v11, %v186_v9 }
  0xbb   : > { %v176_v13 = vpop.xlane.xlu0 %175 }
  0xbc   : > { %v187_v14 = vrot.slane %v176_v13, %v186_v9  ;;  %197 = vst.msk [vmem:[%s161_s23 + $0x1] sm:$0x1] %vm189_vm1, %v195_v12 }
  0xbe   : > { %190 = vst.msk [vmem:[%s161_s23] sm:$0x1] %vm189_vm1, %v187_v14 }
  0xbf   : > { %419 = shalt.err (!%p416_p3)
}
  0xc0   : > { %s420_s3 = scalar_lea.hbm %s211_s27, 32  ;;  %s424_s12 = scalar_lea.hbm %s636_s1, 64 }
  0xc1   : > { %p421_p5 = scmp.ne.s32.totalorder %s211_s27, %s420_s3  ;;  %p425_p10 = scmp.lt.s32.totalorder %s211_s27, %s636_s1 }
  0xc2   : > { %p426_p4 = scmp.lt.s32.totalorder %s424_s12, %s420_s3 }
  0xc3   : > { %p422_p6 = pnand %p421_p5, %p551_p9 }
  0xc4   : > { %p427_p13 = por %p426_p4, %p425_p10 }
  0xc5   : > { %p423_p7 = pneg %p422_p6 }
  0xc7   : > { %p428_p8 = pnand %p427_p13, %p423_p7 }
  0xc9   : > { %431 = shalt.err (!%p428_p8)
}
  0xca   : > { %318 = dma.vmem_to_hbm [thread:$0]  (%p551_p9), %s214_s24, 32, %s211_s27, %s199_s28  }
  0xcb PF: > { %s225_s16 = sand.u32 1, %s466_s6   ;;  %p642_p11 = scmp.ne.s32.totalorder %s640_s21, 0 }
  0xcc   : > { %p643_p12 = scmp.ge.s32.totalorder %s486_s11, 2  ;;  %s226_s17 = scalar_lea.sflag [#allocation4], %s225_s16 }
  0xce   : > { %p325_p0 = pnand %p643_p12, %p642_p11 }
  0xd0   : > { %p326_p1 = pneg %p325_p0 }
  0xd2   : > { %461 = dma.done.wait (%p326_p1), %s226_s17, 32  }
  0xd3   : > { %463 = vsyncadd (%p326_p1), %s226_s17, 4294967264  ;;  %s17_s11 = sadd.s32 1, %s486_s11   ;;  %s644_s6 = smov %s470_s7 }
  0xd4   : > { %p14_p2 = scmp.ge.s32.totalorder %s17_s11, 4   ;;  %s645_s7 = smov %s474_s8 }
  0xd5   : > { %s646_s8 = smov %s556_s20  ;;  %s647_s9 = smov %s482_s10 }
  0xd6   : > { %s648_s10 = smov %s650_s14  ;;  %16 = sbr.rel (!%p14_p2) target bundleno = 6 (0x6), region = 74 }
  0xdb   :  { %231 = vsyncpa [#allocation3], 1 }
  0xdc   :  { %233 = vsyncpa [#allocation3 + $0x1], 1 }
  0xdd   :  { %234 = vsyncpa [#allocation4], 1 }
  0xde   :  { %236 = vsyncpa [#allocation4 + $0x1], 1 }

</bundles_post_ra>
